<compile_context>
chip_gen: v7x
topology: tpu7x:2x2x1
jax: 0.10.0
libtpu: 0.0.40
codegen_flags: <defaults>
</compile_context>

<pallas_src>
import functools
import math

import jax
import jax.numpy as jnp
from jax.experimental import pallas as pl
from jax.experimental.pallas import tpu as pltpu


_MAX_LANES = 8192                 # cap on lane width when growing past lcm(C,128)
_MIN_PALLAS_BYTES = 64 * 1024     # below this, a fused XLA add beats kernel launch


def _cdiv(a, b):
    return -(-a // b)


def _round_up(a, b):
    return _cdiv(a, b) * b


# ----------------------------------------------------------------------------
# Kernel
# ----------------------------------------------------------------------------
def _lane_dense_kernel(C, x_ref, t_ref, o_ref):
    # x_ref: (rows_pb, L) block of the flattened (rows, L) view of points.
    # t_ref: (1, L) translation slab, C-periodic: [tx, ty, tz, 0, ...] tiled.
    # Every row starts at a flat offset that is a multiple of L (itself a
    # multiple of C) and the block's lane offset is always 0, so the channel
    # of lane j is j % C.
    x = x_ref[...]
    # (1, L) mask only; jnp.where broadcasts it over the sublane dim.
    lane = jax.lax.broadcasted_iota(jnp.int32, (1, x.shape[1]), dimension=1)
    is_xyz = (lane % C) < 3
    o_ref[...] = jnp.where(is_xyz, x + t_ref[...], x)


# ----------------------------------------------------------------------------
# Block-size policy (generation gated)
# ----------------------------------------------------------------------------
@functools.lru_cache(maxsize=None)
def _block_policy():
    """Returns (target_block_bytes, vmem_limit_bytes, want_two_grid_steps)."""
    kind = ""
    try:
        kind = jax.devices()[0].device_kind.lower()
    except Exception:  # pragma: no cover - defensive
        pass
    if "7" in kind:
        # v7x: 3.2 TB/s HBM -> bigger blocks amortize per-step overhead;
        # 2 in + 2 out buffers at 6 MiB = 24 MiB scoped VMEM (64 MiB physical).
        # Two TensorCores -> keep the grid at >= 2 steps.
        return 6 * 1024 * 1024, 40 * 1024 * 1024, True
    # v5e (16 MiB scoped-VMEM default) / v6e: ~2 MiB blocks already reach
    # ~85% of the HBM roofline; single TensorCore, no need to split the grid.
    return 2 * 1024 * 1024, None, False


# ----------------------------------------------------------------------------
# Lane-dense Pallas path on a flat, lcm(C,128)-divisible chunk
# ----------------------------------------------------------------------------
def _translate_lane_dense(flat, t3, C, alias):
    total = flat.shape[0]
    dtype = flat.dtype
    itemsize = jnp.dtype(dtype).itemsize

    l_base = (C * 128) // math.gcd(C, 128)        # lcm(C, 128)
    assert total % l_base == 0
    L = l_base
    while L * 2 <= _MAX_LANES and total % (L * 2) == 0:
        L *= 2
    rows = total // L
    x2d = flat.reshape(rows, L)

    t_c = jnp.zeros((C,), dtype=dtype).at[:3].set(t3)
    t_slab = jnp.tile(t_c, L // C).reshape(1, L)  # C-periodic pattern

    target_bytes, vmem_limit, want_two_steps = _block_policy()
    sublane = max(8, 32 // itemsize)              # 8 f32, 16 bf16, 32 int8/fp8

    if rows <= sublane:
        rows_pb = rows                            # full dim -> layout exempt
    else:
        target = max(sublane,
                     (target_bytes // (L * itemsize)) // sublane * sublane)
        rows_pb = min(rows, target)
        if want_two_steps and rows_pb >= rows:
            # Split across both v7x TensorCores even when one block would fit.
            rows_pb = min(rows, _round_up(_cdiv(rows, 2), sublane))
    grid = (_cdiv(rows, rows_pb),)                # partial tail block is masked

    kwargs = {}
    if alias:
        # Mirrors PyTorch's in-place update; only actually in-place if the
        # caller donates the input, otherwise XLA inserts a defensive copy.
        kwargs["input_output_aliases"] = {0: 0}

    out2d = pl.pallas_call(
        functools.partial(_lane_dense_kernel, C),
        out_shape=jax.ShapeDtypeStruct((rows, L), dtype),
        grid=grid,
        in_specs=[
            pl.BlockSpec((rows_pb, L), lambda i: (i, 0)),
            pl.BlockSpec((1, L), lambda i: (0, 0)),   # constant -> single DMA
        ],
        out_specs=pl.BlockSpec((rows_pb, L), lambda i: (i, 0)),
        compiler_params=pltpu.CompilerParams(
            dimension_semantics=("parallel",),
            vmem_limit_bytes=vmem_limit),
        **kwargs,
    )(x2d, t_slab)
    return out2d.reshape(total)


# ----------------------------------------------------------------------------
# Public wrapper
# ----------------------------------------------------------------------------
def pointcloud_translation(points, key, translation, *, in_place=True):
    """Translate the xyz channels of a (B, N, C>=3) point cloud by a shared
    uniform [-translation, translation) vector; feature channels untouched.

    `in_place=True` sets input_output_aliases={0: 0}; for that to really be
    in-place the caller must donate `points` (jit donate_argnums / no later
    uses), otherwise XLA silently inserts a defensive copy.
    """
    B, N, C = points.shape
    assert C >= 3, "need at least xyz channels"
    dtype = points.dtype
    itemsize = jnp.dtype(dtype).itemsize

    # torch.rand(3) * 2*t - t  ->  uniform in [-t, t).  Draw in f32 (like
    # torch.rand) then cast, so bf16 clouds don't get a coarsely-quantized draw.
    t3 = (jax.random.uniform(key, (3,), dtype=jnp.float32) * (2.0 * translation)
          - translation).astype(dtype)

    total = B * N * C
    l_base = (C * 128) // math.gcd(C, 128)        # lcm(C, 128)

    # Tiny clouds: single-step grids are launch-latency dominated; a fused XLA
    # broadcast-add is cheaper and identical in result.
    if total < l_base or total * itemsize < _MIN_PALLAS_BYTES:
        return points.at[:, :, :3].add(t3)

    flat = points.reshape(total)
    bulk = (total // l_base) * l_base
    tail = total - bulk                           # < l_base, multiple of C

    if tail == 0:
        out = _translate_lane_dense(flat, t3, C, alias=in_place)
        return out.reshape(B, N, C)

    # Irregular totals: lane-dense bulk + tiny XLA tail.  Both chunks start at
    # a multiple of C, so channel index == position-within-chunk % C.
    bulk_out = _translate_lane_dense(flat[:bulk], t3, C, alias=False)
    tail_out = flat[bulk:].reshape(-1, C).at[:, :3].add(t3).reshape(-1)
    return jnp.concatenate([bulk_out, tail_out]).reshape(B, N, C)


# ----------------------------------------------------------------------------
# Self-test
# ----------------------------------------------------------------------------
if __name__ == "__main__":
    keys = jax.random.split(jax.random.PRNGKey(0), 8)

    def reference(points, key, translation):
        t3 = (jax.random.uniform(key, (3,), dtype=jnp.float32)
              * (2.0 * translation) - translation).astype(points.dtype)
        return points.at[:, :, :3].add(t3)

    # ---- 1) lane-dense fast path (f32, regular shape) ----
    B, N, C = 2, 8192, 4
    pts = jax.random.normal(keys[0], (B, N, C), dtype=jnp.float32)
    ref = reference(pts, keys[1], 0.2)
    out = jax.block_until_ready(pointcloud_translation(pts, keys[1], 0.2))
    assert out.shape == (B, N, C)
    assert jnp.allclose(out, ref, atol=1e-6), "fast path mismatch"
    assert jnp.array_equal(out[:, :, 3:], pts[:, :, 3:]), "features modified"

    # ---- 2) irregular total: lane-dense bulk + XLA tail ----
    B2, N2, C2 = 3, 2011, 5
    pts2 = jax.random.normal(keys[2], (B2, N2, C2), dtype=jnp.float32)
    ref2 = reference(pts2, keys[3], 0.1)
    out2 = jax.block_until_ready(pointcloud_translation(pts2, keys[3], 0.1))
    assert jnp.allclose(out2, ref2, atol=1e-6), "bulk+tail mismatch"
    assert jnp.array_equal(out2[:, :, 3:], pts2[:, :, 3:]), "features modified"

    # ---- 3) tiny cloud: plain-XLA path ----
    pts3 = jax.random.normal(keys[4], (2, 16, 4), dtype=jnp.float32)
    ref3 = reference(pts3, keys[5], 0.3)
    out3 = jax.block_until_ready(pointcloud_translation(pts3, keys[5], 0.3))
    assert jnp.allclose(out3, ref3, atol=1e-6), "tiny path mismatch"

    # ---- 4) bf16 cloud (dtype-aware sublane rounding, f32-drawn translation) ----
    pts4 = jax.random.normal(keys[6], (2, 8192, 4), dtype=jnp.bfloat16)
    ref4 = reference(pts4, keys[7], 0.2)
    out4 = jax.block_until_ready(pointcloud_translation(pts4, keys[7], 0.2))
    assert jnp.allclose(out4.astype(jnp.float32), ref4.astype(jnp.float32),
                        atol=2e-2), "bf16 path mismatch"

    print("KERNEL_OK")
</pallas_src>

<mosaic_0001>
module attributes {stable_mosaic.version = 11 : i64} {
  func.func @_lane_dense_kernel(%arg0: i32, %arg1: memref<8x8192xf32, #tpu.memory_space<vmem>>, %arg2: memref<1x8192xf32, #tpu.memory_space<vmem>>, %arg3: memref<8x8192xf32, #tpu.memory_space<vmem>>) attributes {dimension_semantics = [#tpu.dimension_semantics<parallel>], iteration_bounds = array<i64: 1>, scalar_prefetch = 0 : i64, scratch_operands = 0 : i64, tpu.core_type = #tpu.core_type<tc>, window_params = [{transform_indices = @transform_0, window_bounds = array<i64: 8, 8192>}, {pipeline_mode = #tpu.pipeline_mode<synchronous>, transform_indices = @transform_1, window_bounds = array<i64: 1, 8192>}, {transform_indices = @transform_2, window_bounds = array<i64: 8, 8192>}]} {
    %c0 = arith.constant 0 : index
    %c0_0 = arith.constant 0 : index
    %0 = vector.load %arg1[%c0, %c0_0] : memref<8x8192xf32, #tpu.memory_space<vmem>>, vector<8x8192xf32>
    %1 = tpu.iota {dimensions = array<i32: 1>} : vector<1x8192xi32>
    %c4_i32 = arith.constant 4 : i32
    %c0_i32 = arith.constant 0 : i32
    %2 = arith.cmpi eq, %c4_i32, %c0_i32 : i32
    %c1_i32 = arith.constant 1 : i32
    %3 = arith.select %2, %c1_i32, %c4_i32 : i32
    %4 = vector.broadcast %3 : i32 to vector<1x8192xi32>
    %5 = arith.remsi %1, %4 : vector<1x8192xi32>
    %c0_i32_1 = arith.constant 0 : i32
    %6 = vector.broadcast %c0_i32_1 : i32 to vector<1x8192xi32>
    %7 = arith.cmpi ne, %5, %6 : vector<1x8192xi32>
    %c0_i32_2 = arith.constant 0 : i32
    %8 = vector.broadcast %c0_i32_2 : i32 to vector<1x8192xi32>
    %9 = arith.cmpi slt, %5, %8 : vector<1x8192xi32>
    %c0_i32_3 = arith.constant 0 : i32
    %10 = arith.cmpi slt, %3, %c0_i32_3 : i32
    %11 = vector.broadcast %10 : i1 to vector<1x8192xi1>
    %12 = vector.broadcast %11 : vector<1x8192xi1> to vector<1x8192xi1>
    %13 = arith.xori %9, %12 : vector<1x8192xi1>
    %14 = arith.andi %13, %7 : vector<1x8192xi1>
    %15 = vector.broadcast %3 : i32 to vector<1x8192xi32>
    %16 = arith.addi %5, %15 : vector<1x8192xi32>
    %17 = arith.select %14, %16, %5 : vector<1x8192xi1>, vector<1x8192xi32>
    %c3_i32 = arith.constant 3 : i32
    %18 = vector.broadcast %c3_i32 : i32 to vector<1x8192xi32>
    %19 = arith.cmpi slt, %17, %18 : vector<1x8192xi32>
    %c0_4 = arith.constant 0 : index
    %c0_5 = arith.constant 0 : index
    %20 = vector.load %arg2[%c0_4, %c0_5] : memref<1x8192xf32, #tpu.memory_space<vmem>>, vector<1x8192xf32>
    %21 = vector.broadcast %20 : vector<1x8192xf32> to vector<8x8192xf32>
    %22 = arith.addf %0, %21 : vector<8x8192xf32>
    %23 = vector.shape_cast %19 : vector<1x8192xi1> to vector<1x8192xi1>
    %24 = vector.broadcast %23 : vector<1x8192xi1> to vector<8x8192xi1>
    %25 = arith.select %24, %22, %0 : vector<8x8192xi1>, vector<8x8192xf32>
    %c0_6 = arith.constant 0 : index
    %c0_7 = arith.constant 0 : index
    %26 = vector.load %arg3[%c0_6, %c0_7] : memref<8x8192xf32, #tpu.memory_space<vmem>>, vector<8x8192xf32>
    tpu.vector_store %arg3[%c0_6, %c0_7], %25 {strides = array<i32>} : memref<8x8192xf32, #tpu.memory_space<vmem>>, vector<8x8192xf32>,
    return
  }
  func.func @transform_0(%arg0: i32) -> (i32, i32) {
    %c0_i32 = arith.constant 0 : i32
    %c0_i32_0 = arith.constant 0 : i32
    return %arg0, %c0_i32 : i32, i32
  }
  func.func @transform_1(%arg0: i32) -> (i32, i32) {
    %c0_i32 = arith.constant 0 : i32
    %c0_i32_0 = arith.constant 0 : i32
    %c0_i32_1 = arith.constant 0 : i32
    return %c0_i32, %c0_i32_0 : i32, i32
  }
  func.func @transform_2(%arg0: i32) -> (i32, i32) {
    %c0_i32 = arith.constant 0 : i32
    %c0_i32_0 = arith.constant 0 : i32
    return %arg0, %c0_i32 : i32, i32
  }
}

</mosaic_0001>

<bundles_post_ra>
// kernel: tpu_custom_call.1
= control target key start
LH: loop header
LB: loop body
LE: loop exit
PB: predicated region body
PF: predicated region fallthrough
CT: control target
= control target key end

     0   :  { %7 = vsyncpa [#allocation3], 0  ;;  %s2035_s0 = inlined_call_operand.hbm [shape: f32[8,8192], index: 0, kind: input, shape index: {}, may-alias: {0,2}]   ;;  %s2036_s1 = inlined_call_operand.vmem [shape: f32[1,8192], index: 1, kind: input, shape index: {}]   ;;  %s2037_s2 = inlined_call_operand.hbm [shape: f32[8,8192], index: 2, kind: output, shape index: {}, may-alias: {0,2}]  }
   0x1   :  { %8 = vsyncpa [#allocation4], 0  ;;  %s1706_s9 = smov [#allocation2]   ;;  %s1658_s13 = scalar_lea.hbm %s2035_s0, 8192 }
   0x2   :  { %s15_s10 = sshll.u32 %s1706_s9, 4  ;;  %p1659_p0 = scmp.ne.s32.totalorder %s2035_s0, %s1658_s13  ;;  %s16_s10 = int_to_ptr.vmem [resolvable:$true] %s15_s10 }
   0x3   :  { %p1662_p1 = scmp.lt.u32.totalorder %s1658_s13, %s2035_s0 }
   0x5   :  { %p1664_p2 = pnand %p1662_p1, %p1659_p0 }
   0x7   :  { %1667 = shalt.err (!%p1664_p2)
}
   0x8   :  { %s1668_s18 = scalar_lea.vmem %s16_s10, 8192  ;;  %p1673_p4 = scmp.lt.s32.totalorder %s16_s10, %s16_s10 }
   0x9   :  { %p1669_p3 = scmp.ne.s32.totalorder %s16_s10, %s1668_s18  ;;  %p1674_p5 = scmp.lt.s32.totalorder %s1668_s18, %s1668_s18 }
   0xb   :  { %p1675_p6 = por %p1674_p5, %p1673_p4 }
   0xd   :  { %p1676_p7 = pnand %p1675_p6, %p1669_p3 }
   0xf   :  { %1679 = shalt.err (!%p1676_p7)
}
  0x10   :  { %18 = dma.hbm_to_vmem [thread:$0]  %s2035_s0, 8192, %s16_s10, [#allocation3]  }
  0x11   :  { %1702 = dma.done.wait [#allocation3], 8192  }
  0x12   :  { %1703 = vsyncadd [#allocation3], 4294959104  ;;  %v88_v0 = vlaneseq  ;;  %v24_v15 = vld [vmem:[#allocation2] sm:$0xff]  ;;  %v25_v17 = vld [vmem:[#allocation2 + $0x8] sm:$0xff] }
  0x13   :  { %v985_v16 = vld [vmem:[%s2036_s1] sm:$0xff]  ;;  %v26_v24 = vld [vmem:[#allocation2 + $0x10] sm:$0xff]  ;;  %v27_v26 = vld [vmem:[#allocation2 + $0x18] sm:$0xff] }
  0x14   :  { %v1735_v1 = vand.u32 127, %v88_v0  ;;  %v1002_v2 = vshrl.u32 %v88_v0, 7  ;;  %v28_v30 = vld [vmem:[#allocation2 + $0x20] sm:$0xff]  ;;  %v29_v44 = vld [vmem:[#allocation2 + $0x28] sm:$0xff]  ;;  %v30_v56 = vld [vmem:[#allocation2 + $0x30] sm:$0xff] }
  0x15   :  { %v1792_v45 = vld [vmem:[%s2036_s1 + $0x8] sm:$0xff]  ;;  %v32_v54 = vld [vmem:[#allocation2 + $0x40] sm:$0xff]  ;;  %v31_v58 = vld [vmem:[#allocation2 + $0x38] sm:$0xff] }
  0x16   :  { %v157_v3 = vand.u32 3, %v1735_v1  ;;  %v1738_v4 = vsub.s32 0, %v1002_v2  ;;  %v90_v5 = vadd.s32 128, %v1735_v1  ;;  %v1741_v6 = vsub.s32 1, %v1002_v2  ;;  %v36_v28 = vld [vmem:[#allocation2 + $0x60] sm:$0xff] }
  0x17   :  { %v91_v7 = vadd.s32 256, %v1735_v1  ;;  %v1744_v8 = vsub.s32 2, %v1002_v2  ;;  %v92_v9 = vadd.s32 384, %v1735_v1  ;;  %v1747_v10 = vsub.s32 3, %v1002_v2 }
  0x18   :  { %vm1749_vm0 = vcmp.lt.s32.totalorder %v157_v3, 3  ;;  %v164_v12 = vand.u32 3, %v90_v5  ;;  %v93_v13 = vadd.s32 512, %v1735_v1  ;;  %v1754_v14 = vsub.s32 4, %v1002_v2 }
  0x19   :  { %v171_v18 = vand.u32 3, %v91_v7  ;;  %v178_v19 = vand.u32 3, %v92_v9  ;;  %v94_v20 = vadd.s32 640, %v1735_v1  ;;  %v1004_v21 = vrot.slane %v985_v16, %v1738_v4 }
  0x1a   :  { %vm1761_vm1 = vcmp.lt.s32.totalorder %v164_v12, 3  ;;  %v1008_v23 = vrot.slane %v985_v16, %v1741_v6  ;;  %v1012_v25 = vrot.slane %v985_v16, %v1744_v8  ;;  %v1016_v29 = vrot.slane %v985_v16, %v1747_v10  ;;  %v33_v12 = vld [vmem:[#allocation2 + $0x48] sm:$0xff] }
  0x1b   :  { %vm1767_vm2 = vcmp.lt.s32.totalorder %v171_v18, 3  ;;  %vm1771_vm3 = vcmp.lt.s32.totalorder %v178_v19, 3  ;;  %v185_v31 = vand.u32 3, %v93_v13  ;;  %v1321_v32 = vadd.f32 %v1004_v21, %v24_v15 }
  0x1c   :  { %v1322_v33 = vadd.f32 %v1008_v23, %v25_v17  ;;  %v1323_v34 = vadd.f32 %v1012_v25, %v26_v24  ;;  %v1020_v35 = vrot.slane %v985_v16, %v1754_v14  ;;  %v1324_v36 = vadd.f32 %v1016_v29, %v27_v26 }
  0x1d   :  { %vm1777_vm4 = vcmp.lt.s32.totalorder %v185_v31, 3  ;;  %v192_v38 = vand.u32 3, %v94_v20  ;;  %v1781_v39 = vsub.s32 5, %v1002_v2  ;;  %v1513_v40 = vsel %vm1749_vm0, %v1321_v32, %v24_v15  ;;  %v34_v15 = vld [vmem:[#allocation2 + $0x50] sm:$0xff]  ;;  %v37_v32 = vld [vmem:[#allocation2 + $0x68] sm:$0xff] }
  0x1e   :  { %v1514_v41 = vsel %vm1761_vm1, %v1322_v33, %v25_v17  ;;  %v1515_v42 = vsel %vm1767_vm2, %v1323_v34, %v26_v24  ;;  %v1325_v43 = vadd.f32 %v1020_v35, %v28_v30  ;;  %1577 = vst [vmem:[#allocation5] sm:$0xff] %v1513_v40  ;;  %v1516_v46 = vsel %vm1771_vm3, %v1324_v36, %v27_v26  ;;  %v35_v26 = vld [vmem:[#allocation2 + $0x58] sm:$0xff] }
  0x1f   :  { %1578 = vst [vmem:[#allocation5 + $0x8] sm:$0xff] %v1514_v41  ;;  %1579 = vst [vmem:[#allocation5 + $0x10] sm:$0xff] %v1515_v42  ;;  %vm1796_vm5 = vcmp.lt.s32.totalorder %v192_v38, 3  ;;  %v1024_v48 = vrot.slane %v985_v16, %v1781_v39  ;;  %v95_v49 = vadd.s32 768, %v1735_v1  ;;  %v1804_v51 = vsub.s32 6, %v1002_v2 }
  0x20   :  { %1580 = vst [vmem:[#allocation5 + $0x18] sm:$0xff] %v1516_v46  ;;  %v1517_v50 = vsel %vm1777_vm4, %v1325_v43, %v28_v30  ;;  %v96_v52 = vadd.s32 896, %v1735_v1  ;;  %v1807_v53 = vsub.s32 7, %v1002_v2  ;;  %v97_v59 = vadd.s32 1024, %v1735_v1 }
  0x21   :  { %1581 = vst [vmem:[#allocation5 + $0x20] sm:$0xff] %v1517_v50  ;;  %v1326_v55 = vadd.f32 %v1024_v48, %v29_v44  ;;  %v199_v57 = vand.u32 3, %v95_v49  ;;  %v1036_v60 = vrot.slane %v1792_v45, %v1738_v4  ;;  %v1028_v61 = vrot.slane %v985_v16, %v1804_v51  ;;  %v39_v49 = vld [vmem:[#allocation2 + $0x78] sm:$0xff] }
  0x22   :  { %v206_v62 = vand.u32 3, %v96_v52  ;;  %v1032_v63 = vrot.slane %v985_v16, %v1807_v53  ;;  %v98_v0 = vadd.s32 1152, %v1735_v1  ;;  %v213_v5 = vand.u32 3, %v97_v59  ;;  %v1850_v52 = vld [vmem:[%s2036_s1 + $0x10] sm:$0xff] }
  0x23   :  { %v1518_v2 = vsel %vm1796_vm5, %v1326_v55, %v29_v44  ;;  %vm1817_vm6 = vcmp.lt.s32.totalorder %v199_v57, 3  ;;  %v1329_v7 = vadd.f32 %v1036_v60, %v32_v54  ;;  %v1327_v9 = vadd.f32 %v1028_v61, %v30_v56  ;;  %v38_v44 = vld [vmem:[#allocation2 + $0x70] sm:$0xff]  ;;  %v40_v60 = vld [vmem:[#allocation2 + $0x80] sm:$0xff] }
  0x24   :  { %1582 = vst [vmem:[#allocation5 + $0x28] sm:$0xff] %v1518_v2  ;;  %vm928_vm7 = vcmp.lt.s32.totalorder %v206_v62, 3  ;;  %v1328_v11 = vadd.f32 %v1032_v63, %v31_v58  ;;  %v220_v13 = vand.u32 3, %v98_v0  ;;  %vm929_vm8 = vcmp.lt.s32.totalorder %v213_v5, 3  ;;  %v41_v0 = vld [vmem:[#allocation2 + $0x88] sm:$0xff] }
  0x25   :  { %v1040_v16 = vrot.slane %v1792_v45, %v1741_v6  ;;  %v99_v17 = vadd.s32 1280, %v1735_v1  ;;  %v1044_v18 = vrot.slane %v1792_v45, %v1744_v8  ;;  %v1519_v19 = vsel %vm1817_vm6, %v1327_v9, %v30_v56 }
  0x26   :  { %v1520_v20 = vsel %vm928_vm7, %v1328_v11, %v31_v58  ;;  %v1521_v21 = vsel %vm929_vm8, %v1329_v7, %v32_v54  ;;  %vm1828_vm9 = vcmp.lt.s32.totalorder %v220_v13, 3  ;;  %1583 = vst [vmem:[#allocation5 + $0x30] sm:$0xff] %v1519_v19  ;;  %v100_v27 = vadd.s32 1408, %v1735_v1 }
  0x27   :  { %1584 = vst [vmem:[#allocation5 + $0x38] sm:$0xff] %v1520_v20  ;;  %1585 = vst [vmem:[#allocation5 + $0x40] sm:$0xff] %v1521_v21  ;;  %v1330_v23 = vadd.f32 %v1040_v16, %v33_v12  ;;  %v227_v24 = vand.u32 3, %v99_v17  ;;  %v1331_v25 = vadd.f32 %v1044_v18, %v34_v15  ;;  %v1048_v29 = vrot.slane %v1792_v45, %v1747_v10  ;;  %v43_v17 = vld [vmem:[#allocation2 + $0x98] sm:$0xff] }
  0x28   :  { %v101_v30 = vadd.s32 1536, %v1735_v1  ;;  %v1052_v31 = vrot.slane %v1792_v45, %v1754_v14  ;;  %v102_v33 = vadd.s32 1664, %v1735_v1  ;;  %v234_v35 = vand.u32 3, %v100_v27 }
  0x29   :  { %v1522_v34 = vsel %vm1828_vm9, %v1330_v23, %v33_v12  ;;  %vm931_vm10 = vcmp.lt.s32.totalorder %v227_v24, 3  ;;  %v1056_v36 = vrot.slane %v1792_v45, %v1781_v39  ;;  %v1332_v38 = vadd.f32 %v1048_v29, %v35_v26  ;;  %v42_v12 = vld [vmem:[#allocation2 + $0x90] sm:$0xff]  ;;  %v45_v29 = vld [vmem:[#allocation2 + $0xa8] sm:$0xff] }
  0x2a   :  { %1586 = vst [vmem:[#allocation5 + $0x48] sm:$0xff] %v1522_v34  ;;  %v1523_v37 = vsel %vm931_vm10, %v1331_v25, %v34_v15  ;;  %v241_v40 = vand.u32 3, %v101_v30  ;;  %v1333_v41 = vadd.f32 %v1052_v31, %v36_v28  ;;  %vm932_vm11 = vcmp.lt.s32.totalorder %v234_v35, 3  ;;  %v44_v25 = vld [vmem:[#allocation2 + $0xa0] sm:$0xff] }
  0x2b   :  { %1587 = vst [vmem:[#allocation5 + $0x50] sm:$0xff] %v1523_v37  ;;  %v248_v42 = vand.u32 3, %v102_v33  ;;  %v1334_v43 = vadd.f32 %v1056_v36, %v37_v32  ;;  %v103_v46 = vadd.s32 1792, %v1735_v1  ;;  %v1524_v47 = vsel %vm932_vm11, %v1332_v38, %v35_v26  ;;  %v46_v37 = vld [vmem:[#allocation2 + $0xb0] sm:$0xff] }
  0x2c   :  { %vm933_vm12 = vcmp.lt.s32.totalorder %v241_v40, 3  ;;  %v1060_v48 = vrot.slane %v1792_v45, %v1804_v51  ;;  %v104_v50 = vadd.s32 1920, %v1735_v1  ;;  %1588 = vst [vmem:[#allocation5 + $0x58] sm:$0xff] %v1524_v47  ;;  %v1064_v56 = vrot.slane %v1792_v45, %v1807_v53 }
  0x2d   :  { %v1525_v54 = vsel %vm933_vm12, %v1333_v41, %v36_v28  ;;  %vm934_vm13 = vcmp.lt.s32.totalorder %v248_v42, 3  ;;  %v255_v55 = vand.u32 3, %v103_v46  ;;  %v105_v61 = vadd.s32 2048, %v1735_v1  ;;  %v47_v42 = vld [vmem:[#allocation2 + $0xb8] sm:$0xff] }
  0x2e   :  { %1589 = vst [vmem:[#allocation5 + $0x60] sm:$0xff] %v1525_v54  ;;  %v1526_v57 = vsel %vm934_vm13, %v1334_v43, %v37_v32  ;;  %v1335_v58 = vadd.f32 %v1060_v48, %v38_v44  ;;  %v262_v59 = vand.u32 3, %v104_v50  ;;  %v1336_v62 = vadd.f32 %v1064_v56, %v39_v49 }
  0x2f   :  { %1590 = vst [vmem:[#allocation5 + $0x68] sm:$0xff] %v1526_v57  ;;  %vm935_vm14 = vcmp.lt.s32.totalorder %v255_v55, 3  ;;  %v1068_v63 = vrot.slane %v1850_v52, %v1738_v4  ;;  %v106_v2 = vadd.s32 2176, %v1735_v1  ;;  %v269_v5 = vand.u32 3, %v105_v61  ;;  %v48_v55 = vld [vmem:[#allocation2 + $0xc0] sm:$0xff] }
  0x30   :  { %v1527_v3 = vsel %vm935_vm14, %v1335_v58, %v38_v44  ;;  %vm936_vm15 = vcmp.lt.s32.totalorder %v262_v59, 3  ;;  %v1072_v45 = vrot.slane %v1850_v52, %v1741_v6  ;;  %v107_v13 = vadd.s32 2304, %v1735_v1  ;;  %v1879_v44 = vld [vmem:[%s2036_s1 + $0x18] sm:$0xff]  ;;  %v49_v59 = vld [vmem:[#allocation2 + $0xc8] sm:$0xff] }
  0x31   :  { %1591 = vst [vmem:[#allocation5 + $0x70] sm:$0xff] %v1527_v3  ;;  %v1528_v7 = vsel %vm936_vm15, %v1336_v62, %v39_v49  ;;  %v1337_v9 = vadd.f32 %v1068_v63, %v40_v60  ;;  %v276_v11 = vand.u32 3, %v106_v2  ;;  %vm937_vm0 = vcmp.lt.s32.totalorder %v269_v5, 3  ;;  %v50_v3 = vld [vmem:[#allocation2 + $0xd0] sm:$0xff] }
  0x32   :  { %1592 = vst [vmem:[#allocation5 + $0x78] sm:$0xff] %v1528_v7  ;;  %v1338_v15 = vadd.f32 %v1072_v45, %v41_v0  ;;  %v1076_v16 = vrot.slane %v1850_v52, %v1744_v8  ;;  %v108_v18 = vadd.s32 2432, %v1735_v1  ;;  %v283_v20 = vand.u32 3, %v107_v13 }
  0x33   :  { %v1529_v19 = vsel %vm937_vm0, %v1337_v9, %v40_v60  ;;  %vm938_vm1 = vcmp.lt.s32.totalorder %v276_v11, 3  ;;  %v1080_v21 = vrot.slane %v1850_v52, %v1747_v10  ;;  %v109_v26 = vadd.s32 2560, %v1735_v1  ;;  %v51_v9 = vld [vmem:[#allocation2 + $0xd8] sm:$0xff] }
  0x34   :  { %1593 = vst [vmem:[#allocation5 + $0x80] sm:$0xff] %v1529_v19  ;;  %v1530_v22 = vsel %vm938_vm1, %v1338_v15, %v41_v0  ;;  %v1339_v23 = vadd.f32 %v1076_v16, %v42_v12  ;;  %v290_v24 = vand.u32 3, %v108_v18  ;;  %vm939_vm2 = vcmp.lt.s32.totalorder %v283_v20, 3  ;;  %v52_v19 = vld [vmem:[#allocation2 + $0xe0] sm:$0xff] }
  0x35   :  { %1594 = vst [vmem:[#allocation5 + $0x88] sm:$0xff] %v1530_v22  ;;  %v1340_v27 = vadd.f32 %v1080_v21, %v43_v17  ;;  %v1084_v28 = vrot.slane %v1850_v52, %v1754_v14  ;;  %v110_v30 = vadd.s32 2688, %v1735_v1  ;;  %v297_v32 = vand.u32 3, %v109_v26 }
  0x36   :  { %v1531_v31 = vsel %vm939_vm2, %v1339_v23, %v42_v12  ;;  %vm940_vm3 = vcmp.lt.s32.totalorder %v290_v24, 3  ;;  %v1088_v33 = vrot.slane %v1850_v52, %v1781_v39  ;;  %v111_v38 = vadd.s32 2816, %v1735_v1  ;;  %v53_v23 = vld [vmem:[#allocation2 + $0xe8] sm:$0xff] }
  0x37   :  { %1595 = vst [vmem:[#allocation5 + $0x90] sm:$0xff] %v1531_v31  ;;  %v1532_v34 = vsel %vm940_vm3, %v1340_v27, %v43_v17  ;;  %v1341_v35 = vadd.f32 %v1084_v28, %v44_v25  ;;  %v304_v36 = vand.u32 3, %v110_v30  ;;  %vm941_vm4 = vcmp.lt.s32.totalorder %v297_v32, 3  ;;  %v54_v31 = vld [vmem:[#allocation2 + $0xf0] sm:$0xff] }
  0x38   :  { %1596 = vst [vmem:[#allocation5 + $0x98] sm:$0xff] %v1532_v34  ;;  %v1342_v40 = vadd.f32 %v1088_v33, %v45_v29  ;;  %v1092_v41 = vrot.slane %v1850_v52, %v1804_v51  ;;  %v112_v43 = vadd.s32 2944, %v1735_v1  ;;  %v311_v47 = vand.u32 3, %v111_v38 }
  0x39   :  { %v1533_v46 = vsel %vm941_vm4, %v1341_v35, %v44_v25  ;;  %vm942_vm5 = vcmp.lt.s32.totalorder %v304_v36, 3  ;;  %v1096_v48 = vrot.slane %v1850_v52, %v1807_v53  ;;  %v113_v56 = vadd.s32 3072, %v1735_v1  ;;  %v55_v35 = vld [vmem:[#allocation2 + $0xf8] sm:$0xff] }
  0x3a   :  { %1597 = vst [vmem:[#allocation5 + $0xa0] sm:$0xff] %v1533_v46  ;;  %v1534_v49 = vsel %vm942_vm5, %v1342_v40, %v45_v29  ;;  %v1343_v50 = vadd.f32 %v1092_v41, %v46_v37  ;;  %v318_v54 = vand.u32 3, %v112_v43  ;;  %vm943_vm6 = vcmp.lt.s32.totalorder %v311_v47, 3  ;;  %v56_v47 = vld [vmem:[#allocation2 + $0x100] sm:$0xff] }
  0x3b   :  { %1598 = vst [vmem:[#allocation5 + $0xa8] sm:$0xff] %v1534_v49  ;;  %v1344_v57 = vadd.f32 %v1096_v48, %v47_v42  ;;  %v1100_v58 = vrot.slane %v1879_v44, %v1738_v4  ;;  %v114_v60 = vadd.s32 3200, %v1735_v1  ;;  %v325_v62 = vand.u32 3, %v113_v56 }
  0x3c   :  { %v1535_v61 = vsel %vm943_vm6, %v1343_v50, %v46_v37  ;;  %vm944_vm7 = vcmp.lt.s32.totalorder %v318_v54, 3  ;;  %v1104_v52 = vrot.slane %v1879_v44, %v1741_v6  ;;  %v115_v5 = vadd.s32 3328, %v1735_v1  ;;  %v1908_v37 = vld [vmem:[%s2036_s1 + $0x20] sm:$0xff]  ;;  %v57_v54 = vld [vmem:[#allocation2 + $0x108] sm:$0xff] }
  0x3d   :  { %1599 = vst [vmem:[#allocation5 + $0xb0] sm:$0xff] %v1535_v61  ;;  %v1536_v63 = vsel %vm944_vm7, %v1344_v57, %v47_v42  ;;  %v1345_v0 = vadd.f32 %v1100_v58, %v48_v55  ;;  %v332_v2 = vand.u32 3, %v114_v60  ;;  %vm945_vm8 = vcmp.lt.s32.totalorder %v325_v62, 3  ;;  %v58_v61 = vld [vmem:[#allocation2 + $0x110] sm:$0xff] }
  0x3e   :  { %1600 = vst [vmem:[#allocation5 + $0xb8] sm:$0xff] %v1536_v63  ;;  %v1346_v45 = vadd.f32 %v1104_v52, %v49_v59  ;;  %v1108_v7 = vrot.slane %v1879_v44, %v1744_v8  ;;  %v116_v11 = vadd.s32 3456, %v1735_v1  ;;  %v339_v13 = vand.u32 3, %v115_v5 }
  0x3f   :  { %v1537_v12 = vsel %vm945_vm8, %v1345_v0, %v48_v55  ;;  %vm946_vm9 = vcmp.lt.s32.totalorder %v332_v2, 3  ;;  %v1112_v15 = vrot.slane %v1879_v44, %v1747_v10  ;;  %v117_v20 = vadd.s32 3584, %v1735_v1  ;;  %v59_v0 = vld [vmem:[#allocation2 + $0x118] sm:$0xff] }
  0x40   :  { %1601 = vst [vmem:[#allocation5 + $0xc0] sm:$0xff] %v1537_v12  ;;  %v1538_v16 = vsel %vm946_vm9, %v1346_v45, %v49_v59  ;;  %v1347_v17 = vadd.f32 %v1108_v7, %v50_v3  ;;  %v346_v18 = vand.u32 3, %v116_v11  ;;  %vm947_vm10 = vcmp.lt.s32.totalorder %v339_v13, 3  ;;  %v60_v12 = vld [vmem:[#allocation2 + $0x120] sm:$0xff] }
  0x41   :  { %1602 = vst [vmem:[#allocation5 + $0xc8] sm:$0xff] %v1538_v16  ;;  %v1348_v21 = vadd.f32 %v1112_v15, %v51_v9  ;;  %v1116_v22 = vrot.slane %v1879_v44, %v1754_v14  ;;  %v118_v24 = vadd.s32 3712, %v1735_v1  ;;  %v353_v26 = vand.u32 3, %v117_v20 }
  0x42   :  { %v1539_v25 = vsel %vm947_vm10, %v1347_v17, %v50_v3  ;;  %vm948_vm11 = vcmp.lt.s32.totalorder %v346_v18, 3  ;;  %v1120_v27 = vrot.slane %v1879_v44, %v1781_v39  ;;  %v119_v32 = vadd.s32 3840, %v1735_v1  ;;  %v61_v17 = vld [vmem:[#allocation2 + $0x128] sm:$0xff] }
  0x43   :  { %1603 = vst [vmem:[#allocation5 + $0xd0] sm:$0xff] %v1539_v25  ;;  %v1540_v28 = vsel %vm948_vm11, %v1348_v21, %v51_v9  ;;  %v1349_v29 = vadd.f32 %v1116_v22, %v52_v19  ;;  %v360_v30 = vand.u32 3, %v118_v24  ;;  %vm949_vm12 = vcmp.lt.s32.totalorder %v353_v26, 3  ;;  %v62_v25 = vld [vmem:[#allocation2 + $0x130] sm:$0xff] }
  0x44   :  { %1604 = vst [vmem:[#allocation5 + $0xd8] sm:$0xff] %v1540_v28  ;;  %v1350_v33 = vadd.f32 %v1120_v27, %v53_v23  ;;  %v1124_v34 = vrot.slane %v1879_v44, %v1804_v51  ;;  %v120_v36 = vadd.s32 3968, %v1735_v1  ;;  %v367_v40 = vand.u32 3, %v119_v32 }
  0x45   :  { %v1541_v38 = vsel %vm949_vm12, %v1349_v29, %v52_v19  ;;  %vm950_vm13 = vcmp.lt.s32.totalorder %v360_v30, 3  ;;  %v1128_v41 = vrot.slane %v1879_v44, %v1807_v53  ;;  %v121_v48 = vadd.s32 4096, %v1735_v1  ;;  %v63_v29 = vld [vmem:[#allocation2 + $0x138] sm:$0xff] }
  0x46   :  { %1605 = vst [vmem:[#allocation5 + $0xe0] sm:$0xff] %v1541_v38  ;;  %v1542_v42 = vsel %vm950_vm13, %v1350_v33, %v53_v23  ;;  %v1351_v43 = vadd.f32 %v1124_v34, %v54_v31  ;;  %v374_v46 = vand.u32 3, %v120_v36  ;;  %vm951_vm14 = vcmp.lt.s32.totalorder %v367_v40, 3  ;;  %v64_v40 = vld [vmem:[#allocation2 + $0x140] sm:$0xff] }
  0x47   :  { %1606 = vst [vmem:[#allocation5 + $0xe8] sm:$0xff] %v1542_v42  ;;  %v1352_v49 = vadd.f32 %v1128_v41, %v55_v35  ;;  %v1132_v50 = vrot.slane %v1908_v37, %v1738_v4  ;;  %v122_v55 = vadd.s32 4224, %v1735_v1  ;;  %v381_v57 = vand.u32 3, %v121_v48 }
  0x48   :  { %v1543_v56 = vsel %vm951_vm14, %v1351_v43, %v54_v31  ;;  %vm952_vm15 = vcmp.lt.s32.totalorder %v374_v46, 3  ;;  %v1136_v44 = vrot.slane %v1908_v37, %v1741_v6  ;;  %v123_v62 = vadd.s32 4352, %v1735_v1  ;;  %v1937_v31 = vld [vmem:[%s2036_s1 + $0x28] sm:$0xff] }
  0x49   :  { %1607 = vst [vmem:[#allocation5 + $0xf0] sm:$0xff] %v1543_v56  ;;  %v1544_v58 = vsel %vm952_vm15, %v1352_v49, %v55_v35  ;;  %v1353_v59 = vadd.f32 %v1132_v50, %v56_v47  ;;  %v388_v60 = vand.u32 3, %v122_v55  ;;  %vm953_vm0 = vcmp.lt.s32.totalorder %v381_v57, 3  ;;  %v65_v46 = vld [vmem:[#allocation2 + $0x148] sm:$0xff]  ;;  %v66_v56 = vld [vmem:[#allocation2 + $0x150] sm:$0xff] }
  0x4a   :  { %1608 = vst [vmem:[#allocation5 + $0xf8] sm:$0xff] %v1544_v58  ;;  %v1354_v52 = vadd.f32 %v1136_v44, %v57_v54  ;;  %v1140_v63 = vrot.slane %v1908_v37, %v1744_v8  ;;  %v124_v2 = vadd.s32 4480, %v1735_v1  ;;  %v395_v5 = vand.u32 3, %v123_v62 }
  0x4b   :  { %v1545_v3 = vsel %vm953_vm0, %v1353_v59, %v56_v47  ;;  %vm954_vm1 = vcmp.lt.s32.totalorder %v388_v60, 3  ;;  %v1144_v45 = vrot.slane %v1908_v37, %v1747_v10  ;;  %v125_v13 = vadd.s32 4608, %v1735_v1  ;;  %v67_v59 = vld [vmem:[#allocation2 + $0x158] sm:$0xff] }
  0x4c   :  { %1609 = vst [vmem:[#allocation5 + $0x100] sm:$0xff] %v1545_v3  ;;  %v1546_v7 = vsel %vm954_vm1, %v1354_v52, %v57_v54  ;;  %v1355_v9 = vadd.f32 %v1140_v63, %v58_v61  ;;  %v402_v11 = vand.u32 3, %v124_v2  ;;  %vm955_vm2 = vcmp.lt.s32.totalorder %v395_v5, 3  ;;  %v68_v3 = vld [vmem:[#allocation2 + $0x160] sm:$0xff] }
  0x4d   :  { %1610 = vst [vmem:[#allocation5 + $0x108] sm:$0xff] %v1546_v7  ;;  %v1356_v15 = vadd.f32 %v1144_v45, %v59_v0  ;;  %v1148_v16 = vrot.slane %v1908_v37, %v1754_v14  ;;  %v126_v18 = vadd.s32 4736, %v1735_v1  ;;  %v409_v20 = vand.u32 3, %v125_v13 }
  0x4e   :  { %v1547_v19 = vsel %vm955_vm2, %v1355_v9, %v58_v61  ;;  %vm956_vm3 = vcmp.lt.s32.totalorder %v402_v11, 3  ;;  %v1152_v21 = vrot.slane %v1908_v37, %v1781_v39  ;;  %v127_v26 = vadd.s32 4864, %v1735_v1  ;;  %v69_v9 = vld [vmem:[#allocation2 + $0x168] sm:$0xff] }
  0x4f   :  { %1611 = vst [vmem:[#allocation5 + $0x110] sm:$0xff] %v1547_v19  ;;  %v1548_v22 = vsel %vm956_vm3, %v1356_v15, %v59_v0  ;;  %v1357_v23 = vadd.f32 %v1148_v16, %v60_v12  ;;  %v416_v24 = vand.u32 3, %v126_v18  ;;  %vm957_vm4 = vcmp.lt.s32.totalorder %v409_v20, 3  ;;  %v70_v19 = vld [vmem:[#allocation2 + $0x170] sm:$0xff] }
  0x50   :  { %1612 = vst [vmem:[#allocation5 + $0x118] sm:$0xff] %v1548_v22  ;;  %v1358_v27 = vadd.f32 %v1152_v21, %v61_v17  ;;  %v1156_v28 = vrot.slane %v1908_v37, %v1804_v51  ;;  %v128_v30 = vadd.s32 4992, %v1735_v1  ;;  %v423_v33 = vand.u32 3, %v127_v26 }
  0x51   :  { %v1549_v32 = vsel %vm957_vm4, %v1357_v23, %v60_v12  ;;  %vm958_vm5 = vcmp.lt.s32.totalorder %v416_v24, 3  ;;  %v1160_v34 = vrot.slane %v1908_v37, %v1807_v53  ;;  %v129_v41 = vadd.s32 5120, %v1735_v1  ;;  %v71_v23 = vld [vmem:[#allocation2 + $0x178] sm:$0xff] }
  0x52   :  { %1613 = vst [vmem:[#allocation5 + $0x120] sm:$0xff] %v1549_v32  ;;  %v1550_v35 = vsel %vm958_vm5, %v1358_v27, %v61_v17  ;;  %v1359_v36 = vadd.f32 %v1156_v28, %v62_v25  ;;  %v430_v38 = vand.u32 3, %v128_v30  ;;  %vm959_vm6 = vcmp.lt.s32.totalorder %v423_v33, 3  ;;  %v72_v33 = vld [vmem:[#allocation2 + $0x180] sm:$0xff] }
  0x53   :  { %1614 = vst [vmem:[#allocation5 + $0x128] sm:$0xff] %v1550_v35  ;;  %v1360_v42 = vadd.f32 %v1160_v34, %v63_v29  ;;  %v1164_v43 = vrot.slane %v1937_v31, %v1738_v4  ;;  %v130_v47 = vadd.s32 5248, %v1735_v1  ;;  %v437_v49 = vand.u32 3, %v129_v41 }
  0x54   :  { %v1551_v48 = vsel %vm959_vm6, %v1359_v36, %v62_v25  ;;  %vm960_vm7 = vcmp.lt.s32.totalorder %v430_v38, 3  ;;  %v1168_v37 = vrot.slane %v1937_v31, %v1741_v6  ;;  %v131_v57 = vadd.s32 5376, %v1735_v1  ;;  %v1966_v25 = vld [vmem:[%s2036_s1 + $0x30] sm:$0xff]  ;;  %v73_v38 = vld [vmem:[#allocation2 + $0x188] sm:$0xff] }
  0x55   :  { %1615 = vst [vmem:[#allocation5 + $0x130] sm:$0xff] %v1551_v48  ;;  %v1552_v50 = vsel %vm960_vm7, %v1360_v42, %v63_v29  ;;  %v1361_v54 = vadd.f32 %v1164_v43, %v64_v40  ;;  %v444_v55 = vand.u32 3, %v130_v47  ;;  %vm961_vm8 = vcmp.lt.s32.totalorder %v437_v49, 3  ;;  %v74_v48 = vld [vmem:[#allocation2 + $0x190] sm:$0xff] }
  0x56   :  { %1616 = vst [vmem:[#allocation5 + $0x138] sm:$0xff] %v1552_v50  ;;  %v1362_v44 = vadd.f32 %v1168_v37, %v65_v46  ;;  %v1172_v58 = vrot.slane %v1937_v31, %v1744_v8  ;;  %v132_v60 = vadd.s32 5504, %v1735_v1  ;;  %v451_v62 = vand.u32 3, %v131_v57 }
  0x57   :  { %v1553_v61 = vsel %vm961_vm8, %v1361_v54, %v64_v40  ;;  %vm962_vm9 = vcmp.lt.s32.totalorder %v444_v55, 3  ;;  %v1176_v52 = vrot.slane %v1937_v31, %v1747_v10  ;;  %v133_v5 = vadd.s32 5632, %v1735_v1  ;;  %v75_v54 = vld [vmem:[#allocation2 + $0x198] sm:$0xff] }
  0x58   :  { %1617 = vst [vmem:[#allocation5 + $0x140] sm:$0xff] %v1553_v61  ;;  %v1554_v63 = vsel %vm962_vm9, %v1362_v44, %v65_v46  ;;  %v1363_v0 = vadd.f32 %v1172_v58, %v66_v56  ;;  %v458_v2 = vand.u32 3, %v132_v60  ;;  %vm963_vm10 = vcmp.lt.s32.totalorder %v451_v62, 3  ;;  %v76_v61 = vld [vmem:[#allocation2 + $0x1a0] sm:$0xff] }
  0x59   :  { %1618 = vst [vmem:[#allocation5 + $0x148] sm:$0xff] %v1554_v63  ;;  %v1364_v45 = vadd.f32 %v1176_v52, %v67_v59  ;;  %v1180_v7 = vrot.slane %v1937_v31, %v1754_v14  ;;  %v134_v11 = vadd.s32 5760, %v1735_v1  ;;  %v465_v13 = vand.u32 3, %v133_v5 }
  0x5a   :  { %v1555_v12 = vsel %vm963_vm10, %v1363_v0, %v66_v56  ;;  %vm964_vm11 = vcmp.lt.s32.totalorder %v458_v2, 3  ;;  %v1184_v15 = vrot.slane %v1937_v31, %v1781_v39  ;;  %v135_v20 = vadd.s32 5888, %v1735_v1  ;;  %v77_v0 = vld [vmem:[#allocation2 + $0x1a8] sm:$0xff] }
  0x5b   :  { %1619 = vst [vmem:[#allocation5 + $0x150] sm:$0xff] %v1555_v12  ;;  %v1556_v16 = vsel %vm964_vm11, %v1364_v45, %v67_v59  ;;  %v1365_v17 = vadd.f32 %v1180_v7, %v68_v3  ;;  %v472_v18 = vand.u32 3, %v134_v11  ;;  %vm965_vm12 = vcmp.lt.s32.totalorder %v465_v13, 3  ;;  %v78_v12 = vld [vmem:[#allocation2 + $0x1b0] sm:$0xff] }
  0x5c   :  { %1620 = vst [vmem:[#allocation5 + $0x158] sm:$0xff] %v1556_v16  ;;  %v1366_v21 = vadd.f32 %v1184_v15, %v69_v9  ;;  %v1188_v22 = vrot.slane %v1937_v31, %v1804_v51  ;;  %v136_v24 = vadd.s32 6016, %v1735_v1  ;;  %v479_v27 = vand.u32 3, %v135_v20 }
  0x5d   :  { %v1557_v26 = vsel %vm965_vm12, %v1365_v17, %v68_v3  ;;  %vm966_vm13 = vcmp.lt.s32.totalorder %v472_v18, 3  ;;  %v1192_v28 = vrot.slane %v1937_v31, %v1807_v53  ;;  %v137_v34 = vadd.s32 6144, %v1735_v1  ;;  %v79_v17 = vld [vmem:[#allocation2 + $0x1b8] sm:$0xff] }
  0x5e   :  { %1621 = vst [vmem:[#allocation5 + $0x160] sm:$0xff] %v1557_v26  ;;  %v1558_v29 = vsel %vm966_vm13, %v1366_v21, %v69_v9  ;;  %v1367_v30 = vadd.f32 %v1188_v22, %v70_v19  ;;  %v486_v32 = vand.u32 3, %v136_v24  ;;  %vm967_vm14 = vcmp.lt.s32.totalorder %v479_v27, 3  ;;  %v80_v27 = vld [vmem:[#allocation2 + $0x1c0] sm:$0xff] }
  0x5f   :  { %1622 = vst [vmem:[#allocation5 + $0x168] sm:$0xff] %v1558_v29  ;;  %v1368_v35 = vadd.f32 %v1192_v28, %v71_v23  ;;  %v1196_v36 = vrot.slane %v1966_v25, %v1738_v4  ;;  %v138_v40 = vadd.s32 6272, %v1735_v1  ;;  %v493_v42 = vand.u32 3, %v137_v34 }
  0x60   :  { %v1559_v41 = vsel %vm967_vm14, %v1367_v30, %v70_v19  ;;  %vm968_vm15 = vcmp.lt.s32.totalorder %v486_v32, 3  ;;  %v1200_v31 = vrot.slane %v1966_v25, %v1741_v6  ;;  %v139_v49 = vadd.s32 6400, %v1735_v1  ;;  %v1995_v19 = vld [vmem:[%s2036_s1 + $0x38] sm:$0xff]  ;;  %v81_v32 = vld [vmem:[#allocation2 + $0x1c8] sm:$0xff]  ;;  %s1707_s1 = smov [#allocation5]  }
  0x61   :  { %1623 = vst [vmem:[#allocation5 + $0x170] sm:$0xff] %v1559_v41  ;;  %v1560_v43 = vsel %vm968_vm15, %v1368_v35, %v71_v23  ;;  %v1369_v46 = vadd.f32 %v1196_v36, %v72_v33  ;;  %v500_v47 = vand.u32 3, %v138_v40  ;;  %vm969_vm0 = vcmp.lt.s32.totalorder %v493_v42, 3  ;;  %v82_v41 = vld [vmem:[#allocation2 + $0x1d0] sm:$0xff]  ;;  %s1647_s8 = sshll.u32 %s1707_s1, 4  ;;  %s1648_s8 = int_to_ptr.vmem [resolvable:$true] %s1647_s8 }
  0x62   :  { %1624 = vst [vmem:[#allocation5 + $0x178] sm:$0xff] %v1560_v43  ;;  %v1370_v37 = vadd.f32 %v1200_v31, %v73_v38  ;;  %v1204_v50 = vrot.slane %v1966_v25, %v1744_v8  ;;  %v140_v55 = vadd.s32 6528, %v1735_v1  ;;  %v507_v57 = vand.u32 3, %v139_v49  ;;  %v83_v43 = vld [vmem:[#allocation2 + $0x1d8] sm:$0xff]  ;;  %s1680_s9 = scalar_lea.vmem %s1648_s8, 8192  ;;  %p1685_p9 = scmp.lt.s32.totalorder %s1648_s8, %s1648_s8 }
  0x63   :  { %v1561_v56 = vsel %vm969_vm0, %v1369_v46, %v72_v33  ;;  %vm970_vm1 = vcmp.lt.s32.totalorder %v500_v47, 3  ;;  %v1208_v44 = vrot.slane %v1966_v25, %v1747_v10  ;;  %v141_v62 = vadd.s32 6656, %v1735_v1  ;;  %p1681_p8 = scmp.ne.s32.totalorder %s1648_s8, %s1680_s9  ;;  %p1686_p10 = scmp.lt.s32.totalorder %s1680_s9, %s1680_s9 }
  0x64   :  { %1625 = vst [vmem:[#allocation5 + $0x180] sm:$0xff] %v1561_v56  ;;  %v1562_v58 = vsel %vm970_vm1, %v1370_v37, %v73_v38  ;;  %v1371_v59 = vadd.f32 %v1204_v50, %v74_v48  ;;  %v514_v60 = vand.u32 3, %v140_v55  ;;  %vm971_vm2 = vcmp.lt.s32.totalorder %v507_v57, 3  ;;  %v85_v57 = vld [vmem:[#allocation2 + $0x1e8] sm:$0xff] }
  0x65   :  { %1626 = vst [vmem:[#allocation5 + $0x188] sm:$0xff] %v1562_v58  ;;  %v1372_v52 = vadd.f32 %v1208_v44, %v75_v54  ;;  %v1212_v63 = vrot.slane %v1966_v25, %v1754_v14  ;;  %v142_v2 = vadd.s32 6784, %v1735_v1  ;;  %v521_v5 = vand.u32 3, %v141_v62  ;;  %p1687_p11 = por %p1686_p10, %p1685_p9 }
  0x66   :  { %v1563_v3 = vsel %vm971_vm2, %v1371_v59, %v74_v48  ;;  %vm972_vm3 = vcmp.lt.s32.totalorder %v514_v60, 3  ;;  %v1216_v45 = vrot.slane %v1966_v25, %v1781_v39  ;;  %v143_v13 = vadd.s32 6912, %v1735_v1 }
  0x67   :  { %1627 = vst [vmem:[#allocation5 + $0x190] sm:$0xff] %v1563_v3  ;;  %v1564_v7 = vsel %vm972_vm3, %v1372_v52, %v75_v54  ;;  %v1373_v9 = vadd.f32 %v1212_v63, %v76_v61  ;;  %v528_v11 = vand.u32 3, %v142_v2  ;;  %vm973_vm4 = vcmp.lt.s32.totalorder %v521_v5, 3  ;;  %v84_v54 = vld [vmem:[#allocation2 + $0x1e0] sm:$0xff]  ;;  %v86_v52 = vld [vmem:[#allocation2 + $0x1f0] sm:$0xff]  ;;  %v87_v2 = vld [vmem:[#allocation2 + $0x1f8] sm:$0xff]  ;;  %p1688_p12 = pnand %p1687_p11, %p1681_p8 }
  0x68   :  { %1628 = vst [vmem:[#allocation5 + $0x198] sm:$0xff] %v1564_v7  ;;  %v1374_v15 = vadd.f32 %v1216_v45, %v77_v0  ;;  %v1220_v16 = vrot.slane %v1966_v25, %v1804_v51  ;;  %v144_v18 = vadd.s32 7040, %v1735_v1  ;;  %v535_v21 = vand.u32 3, %v143_v13 }
  0x69   :  { %v1565_v20 = vsel %vm973_vm4, %v1373_v9, %v76_v61  ;;  %vm974_vm5 = vcmp.lt.s32.totalorder %v528_v11, 3  ;;  %v1224_v22 = vrot.slane %v1966_v25, %v1807_v53  ;;  %v145_v28 = vadd.s32 7168, %v1735_v1 }
  0x6a   :  { %1629 = vst [vmem:[#allocation5 + $0x1a0] sm:$0xff] %v1565_v20  ;;  %v1566_v23 = vsel %vm974_vm5, %v1374_v15, %v77_v0  ;;  %v1375_v24 = vadd.f32 %v1220_v16, %v78_v12  ;;  %v542_v26 = vand.u32 3, %v144_v18  ;;  %vm975_vm6 = vcmp.lt.s32.totalorder %v535_v21, 3 }
  0x6b   :  { %1630 = vst [vmem:[#allocation5 + $0x1a8] sm:$0xff] %v1566_v23  ;;  %v1376_v29 = vadd.f32 %v1224_v22, %v79_v17  ;;  %v1228_v30 = vrot.slane %v1995_v19, %v1738_v4  ;;  %v146_v33 = vadd.s32 7296, %v1735_v1  ;;  %v549_v35 = vand.u32 3, %v145_v28 }
  0x6c   :  { %v1567_v34 = vsel %vm975_vm6, %v1375_v24, %v78_v12  ;;  %vm976_vm7 = vcmp.lt.s32.totalorder %v542_v26, 3  ;;  %v1232_v25 = vrot.slane %v1995_v19, %v1741_v6  ;;  %v147_v42 = vadd.s32 7424, %v1735_v1 }
  0x6d   :  { %1631 = vst [vmem:[#allocation5 + $0x1b0] sm:$0xff] %v1567_v34  ;;  %v1568_v36 = vsel %vm976_vm7, %v1376_v29, %v79_v17  ;;  %v1377_v38 = vadd.f32 %v1228_v30, %v80_v27  ;;  %v556_v40 = vand.u32 3, %v146_v33  ;;  %vm977_vm8 = vcmp.lt.s32.totalorder %v549_v35, 3 }
  0x6e   :  { %1632 = vst [vmem:[#allocation5 + $0x1b8] sm:$0xff] %v1568_v36  ;;  %v1378_v31 = vadd.f32 %v1232_v25, %v81_v32  ;;  %v1236_v4 = vrot.slane %v1995_v19, %v1744_v8  ;;  %v148_v46 = vadd.s32 7552, %v1735_v1  ;;  %v563_v48 = vand.u32 3, %v147_v42 }
  0x6f   :  { %v1569_v47 = vsel %vm977_vm8, %v1377_v38, %v80_v27  ;;  %vm978_vm9 = vcmp.lt.s32.totalorder %v556_v40, 3  ;;  %v1240_v6 = vrot.slane %v1995_v19, %v1747_v10  ;;  %v149_v55 = vadd.s32 7680, %v1735_v1 }
  0x70   :  { %1633 = vst [vmem:[#allocation5 + $0x1c0] sm:$0xff] %v1569_v47  ;;  %v1570_v49 = vsel %vm978_vm9, %v1378_v31, %v81_v32  ;;  %v1379_v37 = vadd.f32 %v1236_v4, %v82_v41  ;;  %v570_v50 = vand.u32 3, %v148_v46  ;;  %vm979_vm10 = vcmp.lt.s32.totalorder %v563_v48, 3 }
  0x71   :  { %1634 = vst [vmem:[#allocation5 + $0x1c8] sm:$0xff] %v1570_v49  ;;  %v1380_v56 = vadd.f32 %v1240_v6, %v83_v43  ;;  %v1244_v8 = vrot.slane %v1995_v19, %v1754_v14  ;;  %v150_v44 = vadd.s32 7808, %v1735_v1  ;;  %v577_v59 = vand.u32 3, %v149_v55 }
  0x72   :  { %v1571_v58 = vsel %vm979_vm10, %v1379_v37, %v82_v41  ;;  %vm980_vm11 = vcmp.lt.s32.totalorder %v570_v50, 3  ;;  %v1248_v10 = vrot.slane %v1995_v19, %v1781_v39  ;;  %v151_v63 = vadd.s32 7936, %v1735_v1 }
  0x73   :  { %1635 = vst [vmem:[#allocation5 + $0x1d0] sm:$0xff] %v1571_v58  ;;  %v1572_v60 = vsel %vm980_vm11, %v1380_v56, %v83_v43  ;;  %v1381_v61 = vadd.f32 %v1244_v8, %v84_v54  ;;  %v584_v62 = vand.u32 3, %v150_v44  ;;  %vm981_vm12 = vcmp.lt.s32.totalorder %v577_v59, 3 }
  0x74   :  { %1636 = vst [vmem:[#allocation5 + $0x1d8] sm:$0xff] %v1572_v60  ;;  %v1382_v0 = vadd.f32 %v1248_v10, %v85_v57  ;;  %v1252_v14 = vrot.slane %v1995_v19, %v1804_v51  ;;  %v152_v3 = vadd.s32 8064, %v1735_v1  ;;  %v591_v45 = vand.u32 3, %v151_v63 }
  0x75   :  { %v1573_v5 = vsel %vm981_vm12, %v1381_v61, %v84_v54  ;;  %vm982_vm13 = vcmp.lt.s32.totalorder %v584_v62, 3  ;;  %v1256_v39 = vrot.slane %v1995_v19, %v1807_v53 }
  0x76   :  { %1637 = vst [vmem:[#allocation5 + $0x1e0] sm:$0xff] %v1573_v5  ;;  %v1574_v7 = vsel %vm982_vm13, %v1382_v0, %v85_v57  ;;  %v1383_v9 = vadd.f32 %v1252_v14, %v86_v52  ;;  %v598_v11 = vand.u32 3, %v152_v3  ;;  %vm983_vm14 = vcmp.lt.s32.totalorder %v591_v45, 3 }
  0x77   :  { %1638 = vst [vmem:[#allocation5 + $0x1e8] sm:$0xff] %v1574_v7  ;;  %v1384_v12 = vadd.f32 %v1256_v39, %v87_v2 }
  0x78   :  { %v1575_v13 = vsel %vm983_vm14, %v1383_v9, %v86_v52  ;;  %vm984_vm15 = vcmp.lt.s32.totalorder %v598_v11, 3 }
  0x79   :  { %1639 = vst [vmem:[#allocation5 + $0x1f0] sm:$0xff] %v1575_v13  ;;  %v1576_v1 = vsel %vm984_vm15, %v1384_v12, %v87_v2 }
  0x7a   :  { %1640 = vst [vmem:[#allocation5 + $0x1f8] sm:$0xff] %v1576_v1 }
  0x7b   :  { %1691 = shalt.err (!%p1688_p12)
}
  0x7c   :  { %s1692_s12 = scalar_lea.hbm %s2037_s2, 8192 }
  0x7d   :  { %p1693_p13 = scmp.ne.s32.totalorder %s2037_s2, %s1692_s12  ;;  %p1696_p0 = scmp.lt.u32.totalorder %s1692_s12, %s2037_s2 }
  0x7f   :  { %p1698_p1 = pnand %p1696_p0, %p1693_p13 }
  0x81   :  { %1701 = shalt.err (!%p1698_p1)
}
  0x82   :  { %1650 = dma.vmem_to_hbm [thread:$0]  %s1648_s8, 8192, %s2037_s2, [#allocation4]  }
  0x83   :  { %1704 = dma.done.wait [#allocation4], 8192  }
  0x84   :  { %1705 = vsyncadd [#allocation4], 4294959104 }
  0x85   :  { %1654 = vsyncpa [#allocation3], 1 }
  0x86   :  { %1655 = vsyncpa [#allocation4], 1 }

</bundles_post_ra>
